<compile_context>
chip_gen: v5e
topology: v5e:2x2
jax: 0.10.0
libtpu: 0.0.40
codegen_flags: <defaults>
</compile_context>

<pallas_src>
import functools

import numpy as np
import jax
import jax.numpy as jnp
from jax.experimental import pallas as pl
from jax.experimental.pallas import tpu as pltpu


# ----------------------------------------------------------------------------
# Host-side neighbor filtering (exact port of filter_neighs_ada_threshold).
# TODO(synk): this per-node ragged sort/select produces Python lists/sets, not
# tensors; it has no clean Pallas equivalent and stays in numpy.
# ----------------------------------------------------------------------------
def filter_neighs_ada_threshold(center_scores, neigh_scores, neighs_list, sample_list):
    samp_neighs = []
    samp_scores = []
    for idx in range(len(center_scores)):
        center_score = float(center_scores[idx][0])
        neigh_score = np.asarray(neigh_scores[idx])[:, 0].reshape(-1)
        neighs_indices = neighs_list[idx]
        num_sample = sample_list[idx]
        score_diff = np.abs(center_score - neigh_score)
        sorted_indices = np.argsort(score_diff, kind="stable")
        sorted_scores = score_diff[sorted_indices]
        if len(neigh_scores[idx]) > num_sample + 1:
            selected_neighs = [neighs_indices[n] for n in sorted_indices[:num_sample]]
            selected_scores = sorted_scores[:num_sample].tolist()
        else:
            selected_neighs = neighs_indices
            selected_scores = score_diff.tolist()
            if isinstance(selected_scores, float):
                selected_scores = [selected_scores]
        samp_neighs.append(set(selected_neighs))
        samp_scores.append(selected_scores)
    return samp_neighs, samp_scores


# ----------------------------------------------------------------------------
# Pallas kernel: tiled  relu( (mask @ embed) * inv_count )
#   mask  : (Bp, Up) int8 (0/1)          -> blocks (TM, TK), cast->bf16 in-kernel
#   embed : (Up, Dp) bf16                -> blocks (TK, TN)
#   inv   : (Bp, 1)  f32 1/neigh_count   -> blocks (TM, 1)   (0 for empty/pad rows)
#   out   : (Bp, Dp) f32                 -> blocks (TM, TN)
#   acc   : VMEM (TM, TN) f32 scratch accumulator across the K grid axis.
# ----------------------------------------------------------------------------
def _intra_agg_kernel(mask_ref, embed_ref, inv_ref, out_ref, acc_ref):
    k = pl.program_id(2)

    @pl.when(k == 0)
    def _init():
        acc_ref[...] = jnp.zeros_like(acc_ref)

    # int8 0/1 mask -> bf16 just before the MXU op (lossless; VPU cast hidden
    # under the MXU / DMA pipeline).
    acc_ref[...] += jnp.dot(
        mask_ref[...].astype(jnp.bfloat16),
        embed_ref[...],
        preferred_element_type=jnp.float32,
    )

    @pl.when(k == pl.num_programs(2) - 1)
    def _finalize():
        # inv is precomputed on host (0 for padded / empty rows -> output 0;
        # the PyTorch reference would produce NaN for truly empty rows).
        out_ref[...] = jnp.maximum(acc_ref[...] * inv_ref[...], 0.0)


def _bucket(n, minimum):
    """Next power of two >= max(n, minimum): bounds the set of compiled shapes."""
    return max(minimum, pl.next_power_of_2(int(n)))


def _tpu_generation():
    try:
        kind = jax.devices()[0].device_kind.lower()
    except Exception:
        return "unknown"
    if "v7" in kind:
        return "v7x"
    if "v6" in kind:
        return "v6e"
    if "v5" in kind:
        return "v5e"
    return "unknown"


# Per-generation tile caps + VMEM ceiling:
#   v6e: 128 MiB physical VMEM -> large K tiles.
#   v7x: 64 MiB physical (32 MiB scoped default) -> smaller buffered budget.
#   v5e: 16 MiB scoped default -> explicit limit, conservative tiles.
_TILE_TABLE = {
    # gen:  (TM_cap, TK_cap, TN_cap, vmem_ceiling_bytes)
    "v6e": (512, 2048, 512, 100 << 20),
    "v7x": (512, 1024, 512, 30 << 20),
    "v5e": (256, 1024, 512, 64 << 20),
    "unknown": (256, 1024, 512, 16 << 20),
}


def _pick_tiles(Bp, Up, Dp, gen):
    tm_cap, tk_cap, tn_cap, vmem_ceiling = _TILE_TABLE[gen]
    # TN = Dp whenever it fits: a single N step means the dominant (Bp x Up)
    # mask panel is streamed from HBM exactly once.
    TN = min(Dp, tn_cap)
    TM = min(Bp, tm_cap)
    TK = min(Up, tk_cap)
    if gen == "v7x":
        # 2 TensorCores per chip: make sure the parallel axes have >= 2 steps.
        while (Bp // TM) * (Dp // TN) < 2 and TM > 32:
            TM //= 2
    return TM, TN, TK, vmem_ceiling


def _vmem_limit_bytes(TM, TN, TK, ceiling):
    buffered = (
        2 * TM * TK * 1      # int8 mask, double-buffered
        + 2 * TK * TN * 2    # bf16 embed, double-buffered
        + 2 * TM * TN * 4    # f32 out, double-buffered
        + 2 * TM * 1 * 4     # f32 inv counts
        + TM * TN * 4        # f32 accumulator scratch
    )
    return min(max(int(buffered * 1.5) + (2 << 20), 8 << 20), ceiling)


@functools.lru_cache(maxsize=None)
def _build_intra_agg_call(Bp, Up, Dp):
    """Build (and cache) the jitted pallas_call for one bucketed shape."""
    gen = _tpu_generation()
    TM, TN, TK, ceiling = _pick_tiles(Bp, Up, Dp, gen)
    grid = (Bp // TM, Dp // TN, Up // TK)

    # Honest byte accounting under this tiling (mask re-read per N step, embed
    # re-read per M step, inv + f32 output once).
    cost = pl.CostEstimate(
        flops=2 * Bp * Up * Dp,
        transcendentals=0,
        bytes_accessed=(
            Bp * Up * 1 * (Dp // TN)
            + Up * Dp * 2 * (Bp // TM)
            + Bp * 4
            + Bp * Dp * 4
        ),
    )

    # TODO(synk): on v7x, sweep pipeline_mode=pl.Buffered(3) on the mask/embed
    # BlockSpecs (extra buffer hides exposed DMA at K-step boundaries).
    call = pl.pallas_call(
        _intra_agg_kernel,
        out_shape=jax.ShapeDtypeStruct((Bp, Dp), jnp.float32),
        grid_spec=pltpu.PrefetchScalarGridSpec(
            num_scalar_prefetch=0,
            grid=grid,
            in_specs=[
                pl.BlockSpec((TM, TK), lambda i, j, k: (i, k)),   # int8 mask
                pl.BlockSpec((TK, TN), lambda i, j, k: (k, j)),   # bf16 embed
                pl.BlockSpec((TM, 1), lambda i, j, k: (i, 0)),    # f32 inv counts
            ],
            out_specs=pl.BlockSpec((TM, TN), lambda i, j, k: (i, j)),
            scratch_shapes=[pltpu.VMEM((TM, TN), jnp.float32)],
        ),
        compiler_params=pltpu.CompilerParams(
            dimension_semantics=("parallel", "parallel", "arbitrary"),
            vmem_limit_bytes=_vmem_limit_bytes(TM, TN, TK, ceiling),
        ),
        cost_estimate=cost,
    )
    return jax.jit(call)


def intra_agg_pallas(mask_pad, embed_pad, inv_counts_pad, B, D):
    """mask_pad: (Bp,Up) int8; embed_pad: (Up,Dp) bf16; inv_counts_pad: (Bp,1) f32."""
    Bp, Up = mask_pad.shape
    Up2, Dp = embed_pad.shape
    assert Up == Up2
    call = _build_intra_agg_call(Bp, Up, Dp)
    out = call(mask_pad, embed_pad, inv_counts_pad)   # (Bp, Dp) f32
    return out[:B, :D]


# ----------------------------------------------------------------------------
# IntraAgg module (JAX version)
# ----------------------------------------------------------------------------
class IntraAgg:
    def __init__(self, features, feat_dim):
        # features: (num_nodes, feat_dim) embedding table.
        self.features = jnp.asarray(features, dtype=jnp.float32)
        self.feat_dim = feat_dim
        # Pre-pad + bf16-cast the feature table ONCE so the per-call gather
        # directly produces the padded kernel input (no per-call pad copy).
        self._Dp = _bucket(feat_dim, 128)
        feats_bf16 = self.features.astype(jnp.bfloat16)
        self._features_bf16_padded = jnp.pad(
            feats_bf16, ((0, 0), (0, self._Dp - feat_dim))
        )

    def forward(self, nodes, to_neighs_list, batch_scores, neigh_scores, sample_list):
        samp_neighs, samp_scores = filter_neighs_ada_threshold(
            batch_scores, neigh_scores, to_neighs_list, sample_list
        )
        unique_nodes_list = list(set.union(*samp_neighs))
        unique_nodes = {n: i for i, n in enumerate(unique_nodes_list)}

        B = len(samp_neighs)
        U = len(unique_nodes_list)
        Bp = _bucket(B, 32)      # 32: int8 sublane pack
        Up = _bucket(U, 128)
        Dp = self._Dp

        # Vectorized int8 mask scatter + per-row counts (no Python double loop,
        # no ml_dtypes per-element assignment). Host->device copy is int8.
        lengths = np.fromiter((len(sn) for sn in samp_neighs), dtype=np.int64, count=B)
        nnz = int(lengths.sum())
        rows = np.repeat(np.arange(B, dtype=np.int64), lengths)
        cols = np.fromiter(
            (unique_nodes[n] for sn in samp_neighs for n in sn),
            dtype=np.int64, count=nnz,
        )
        mask = np.zeros((Bp, Up), dtype=np.int8)
        mask[rows, cols] = 1

        # Precompute 1/count on host (0 for empty / padded rows) so the kernel
        # epilogue is just a multiply + relu.
        inv_counts = np.zeros((Bp, 1), dtype=np.float32)
        inv_counts[:B, 0] = np.where(
            lengths > 0, 1.0 / np.maximum(lengths, 1), 0.0
        ).astype(np.float32)

        # Single XLA gather on the pre-padded bf16 table -> (Up, Dp), already
        # padded.  Padding index 0 rows are masked out by the zero mask columns.
        # TODO(synk): a fully in-kernel gather (manual per-row DMA driven by a
        # scalar-prefetched index vector) is not worthwhile for small feat_dim.
        idx_pad = np.zeros((Up,), dtype=np.int32)
        idx_pad[:U] = np.asarray(unique_nodes_list, dtype=np.int32)
        embed_pad = self._features_bf16_padded[jnp.asarray(idx_pad)]

        to_feats = intra_agg_pallas(
            jnp.asarray(mask), embed_pad, jnp.asarray(inv_counts), B, self.feat_dim
        )
        return to_feats, samp_scores


# ----------------------------------------------------------------------------
# Demo / smoke test
# ----------------------------------------------------------------------------
if __name__ == "__main__":
    key = jax.random.PRNGKey(0)
    k_feat, k_batch, k_neigh = jax.random.split(key, 3)

    num_nodes = 64
    feat_dim = 32
    batch = 8

    features = jax.random.normal(k_feat, (num_nodes, feat_dim), dtype=jnp.float32)

    nodes = list(range(batch))
    # deterministic ragged neighbor lists
    to_neighs_list = [
        [(i * 7 + 3 * j + 1) % num_nodes for j in range(4 + (i % 3))] for i in range(batch)
    ]
    sample_list = [3] * batch

    batch_scores = np.asarray(
        jax.random.uniform(k_batch, (batch, 2), dtype=jnp.float32)
    )
    neigh_scores = []
    kk = k_neigh
    for i in range(batch):
        kk, sub = jax.random.split(kk)
        neigh_scores.append(
            np.asarray(
                jax.random.uniform(sub, (len(to_neighs_list[i]), 2), dtype=jnp.float32)
            )
        )

    agg = IntraAgg(features, feat_dim)
    to_feats, samp_scores = agg.forward(
        nodes, to_neighs_list, batch_scores, neigh_scores, sample_list
    )
    to_feats = jax.block_until_ready(to_feats)

    # silent numpy reference check (float64 math on the same bf16-rounded embeds)
    samp_neighs, _ = filter_neighs_ada_threshold(
        batch_scores, neigh_scores, to_neighs_list, sample_list
    )
    unique_nodes_list = list(set.union(*samp_neighs))
    unique_nodes = {n: i for i, n in enumerate(unique_nodes_list)}
    mask_ref = np.zeros((batch, len(unique_nodes_list)), np.float64)
    for i, sn in enumerate(samp_neighs):
        for n in sn:
            mask_ref[i, unique_nodes[n]] = 1.0
    mask_ref = mask_ref / mask_ref.sum(1, keepdims=True)
    embed_bf16 = np.asarray(features.astype(jnp.bfloat16)).astype(np.float64)
    embed_ref = embed_bf16[np.asarray(unique_nodes_list, np.int64)]
    ref = np.maximum(mask_ref @ embed_ref, 0.0)

    assert to_feats.shape == (batch, feat_dim)
    np.testing.assert_allclose(np.asarray(to_feats, np.float64), ref, rtol=1e-4, atol=1e-5)

    print("KERNEL_OK")
</pallas_src>

<mosaic_0001>
module attributes {stable_mosaic.version = 11 : i64} {
  func.func @_intra_agg_kernel(%arg0: i32, %arg1: i32, %arg2: i32, %arg3: memref<32x128xi8, #tpu.memory_space<vmem>>, %arg4: memref<128x128xbf16, #tpu.memory_space<vmem>>, %arg5: memref<32x1xf32, #tpu.memory_space<vmem>>, %arg6: memref<32x128xf32, #tpu.memory_space<vmem>>, %arg7: memref<32x128xf32, #tpu.memory_space<vmem>>) attributes {dimension_semantics = [#tpu.dimension_semantics<parallel>, #tpu.dimension_semantics<parallel>, #tpu.dimension_semantics<arbitrary>], iteration_bounds = array<i64: 1, 1, 1>, scalar_prefetch = 0 : i64, scratch_operands = 1 : i64, tpu.core_type = #tpu.core_type<tc>, window_params = [{transform_indices = @transform_0, window_bounds = array<i64: 32, 128>}, {transform_indices = @transform_1, window_bounds = array<i64: 128, 128>}, {transform_indices = @transform_2, window_bounds = array<i64: 32, 1>}, {transform_indices = @transform_3, window_bounds = array<i64: 32, 128>}]} {
    %c0_i32 = arith.constant 0 : i32
    %0 = arith.cmpi eq, %arg2, %c0_i32 : i32
    %1 = arith.extui %0 : i1 to i32
    %c0_i32_0 = arith.constant 0 : i32
    %2 = arith.cmpi ne, %1, %c0_i32_0 : i32
    scf.if %2 {
      %cst_10 = arith.constant 0.000000e+00 : f32
      %13 = vector.broadcast %cst_10 : f32 to vector<32x128xf32>
      %c0_11 = arith.constant 0 : index
      %c0_12 = arith.constant 0 : index
      %14 = vector.load %arg7[%c0_11, %c0_12] : memref<32x128xf32, #tpu.memory_space<vmem>>, vector<32x128xf32>
      tpu.vector_store %arg7[%c0_11, %c0_12], %13 {strides = array<i32>} : memref<32x128xf32, #tpu.memory_space<vmem>>, vector<32x128xf32>,
    } else {
    }
    %c0 = arith.constant 0 : index
    %c0_1 = arith.constant 0 : index
    %3 = vector.load %arg7[%c0, %c0_1] : memref<32x128xf32, #tpu.memory_space<vmem>>, vector<32x128xf32>
    %c0_2 = arith.constant 0 : index
    %c0_3 = arith.constant 0 : index
    %4 = vector.load %arg3[%c0_2, %c0_3] : memref<32x128xi8, #tpu.memory_space<vmem>>, vector<32x128xi8>
    %5 = arith.sitofp %4 : vector<32x128xi8> to vector<32x128xbf16>
    %c0_4 = arith.constant 0 : index
    %c0_5 = arith.constant 0 : index
    %6 = vector.load %arg4[%c0_4, %c0_5] : memref<128x128xbf16, #tpu.memory_space<vmem>>, vector<128x128xbf16>
    %cst = arith.constant dense<0.000000e+00> : vector<32x128xf32>
    %7 = tpu.matmul %5, %6, %cst {dimension_numbers = #tpu.dot_dimension_numbers<[1], [0], [0], [1], [0, 0, 1, 1], [], []>} : vector<32x128xbf16>, vector<128x128xbf16>, vector<32x128xf32> -> vector<32x128xf32>
    %8 = arith.addf %3, %7 : vector<32x128xf32>
    %c0_6 = arith.constant 0 : index
    %c0_7 = arith.constant 0 : index
    %9 = vector.load %arg7[%c0_6, %c0_7] : memref<32x128xf32, #tpu.memory_space<vmem>>, vector<32x128xf32>
    tpu.vector_store %arg7[%c0_6, %c0_7], %8 {strides = array<i32>} : memref<32x128xf32, #tpu.memory_space<vmem>>, vector<32x128xf32>,
    %c0_i32_8 = arith.constant 0 : i32
    %10 = arith.cmpi eq, %arg2, %c0_i32_8 : i32
    %11 = arith.extui %10 : i1 to i32
    %c0_i32_9 = arith.constant 0 : i32
    %12 = arith.cmpi ne, %11, %c0_i32_9 : i32
    scf.if %12 {
      %c0_10 = arith.constant 0 : index
      %c0_11 = arith.constant 0 : index
      %13 = vector.load %arg7[%c0_10, %c0_11] : memref<32x128xf32, #tpu.memory_space<vmem>>, vector<32x128xf32>
      %c0_12 = arith.constant 0 : index
      %c0_13 = arith.constant 0 : index
      %14 = vector.load %arg5[%c0_12, %c0_13] : memref<32x1xf32, #tpu.memory_space<vmem>>, vector<32x1xf32>
      %15 = vector.broadcast %14 : vector<32x1xf32> to vector<32x128xf32>
      %16 = arith.mulf %13, %15 : vector<32x128xf32>
      %cst_14 = arith.constant 0.000000e+00 : f32
      %17 = vector.broadcast %cst_14 : f32 to vector<32x128xf32>
      %18 = arith.maximumf %16, %17 : vector<32x128xf32>
      %c0_15 = arith.constant 0 : index
      %c0_16 = arith.constant 0 : index
      %19 = vector.load %arg6[%c0_15, %c0_16] : memref<32x128xf32, #tpu.memory_space<vmem>>, vector<32x128xf32>
      tpu.vector_store %arg6[%c0_15, %c0_16], %18 {strides = array<i32>} : memref<32x128xf32, #tpu.memory_space<vmem>>, vector<32x128xf32>,
    } else {
    }
    return
  }
  func.func @transform_0(%arg0: i32, %arg1: i32, %arg2: i32) -> (i32, i32) {
    %c0_i32 = arith.constant 0 : i32
    return %arg0, %arg2 : i32, i32
  }
  func.func @transform_1(%arg0: i32, %arg1: i32, %arg2: i32) -> (i32, i32) {
    %c0_i32 = arith.constant 0 : i32
    return %arg2, %arg1 : i32, i32
  }
  func.func @transform_2(%arg0: i32, %arg1: i32, %arg2: i32) -> (i32, i32) {
    %c0_i32 = arith.constant 0 : i32
    %c0_i32_0 = arith.constant 0 : i32
    return %arg0, %c0_i32 : i32, i32
  }
  func.func @transform_3(%arg0: i32, %arg1: i32, %arg2: i32) -> (i32, i32) {
    %c0_i32 = arith.constant 0 : i32
    return %arg0, %arg1 : i32, i32
  }
}

</mosaic_0001>

<bundles_post_ra>
// kernel: tpu_custom_call.1
= control target key start
LH: loop header
LB: loop body
LE: loop exit
PB: predicated region body
PF: predicated region fallthrough
CT: control target
= control target key end

     0   :  { %8 = vsyncpa [#allocation4], 0  ;;  %s364_s0 = inlined_call_operand.vmem [shape: s8[32,128], index: 0, kind: input, shape index: {}]   ;;  %s365_s1 = inlined_call_operand.hbm [shape: bf16[128,128], index: 1, kind: input, shape index: {}]   ;;  %s366_s2 = inlined_call_operand.vmem [shape: f32[32,1], index: 2, kind: input, shape index: {}]   ;;  %s367_s3 = inlined_call_operand.hbm [shape: f32[32,128], index: 3, kind: output, shape index: {}]  }
   0x1   :  { %9 = vsyncpa [#allocation5], 0  ;;  %s16_s14 = sshll.u32 %s365_s1, 4  ;;  %s316_s15 = smov [#allocation3]   ;;  %s17_s14 = int_to_ptr.hbm [resolvable:$true] %s16_s14 }
   0x2   :  { %s18_s16 = sshll.u32 %s316_s15, 4  ;;  %s317_s17 = smov 64   ;;  %s19_s16 = int_to_ptr.vmem [resolvable:$true] %s18_s16 }
   0x3   :  { %s318_s18 = smov 4  }
   0x4   :  { %24 = dma.hbm_to_vmem [thread:$0]  %s17_s14, 1024, %s19_s16, [#allocation4], %s317_s17, %s317_s17, %s318_s18  }
   0x5   :  { %312 = dma.done.wait [#allocation4], 1024  }
   0x6   :  { %313 = vsyncadd [#allocation4], 4294966272  ;;  %v246_v0 = vld [vmem:[#allocation3 + $0x38] sm:$0xff]  ;;  %v245_v1 = vld [vmem:[#allocation3 + $0x30] sm:$0xff]  ;;  %v319_v2 = vmov 0   ;;  %s194_s30 = sshll.u32 %s367_s3, 4  ;;  %s195_s30 = int_to_ptr.hbm [resolvable:$true] %s194_s30 }
   0x7   :  { %118 = vmatpush.bf16.msra.mxu0 %v246_v0  ;;  %247 = vmatpush.bf16.msra.mxu1 %v246_v0  ;;  %v154_v3 = vld [vmem:[%s366_s2 + $0x10] sm:$0xff]  ;;  %v152_v4 = vld [vmem:[%s366_s2] sm:$0xff]  ;;  %v244_v5 = vld [vmem:[#allocation3 + $0x28] sm:$0xff]  ;;  %s321_s4 = smov 128   ;;  %s322_s5 = smov 8  }
   0x8   :  { %263 = vset.pattern.permute.xlu1 %v319_v2  ;;  %262 = vset.pattern.permute.xlu0 %v319_v2  ;;  %v155_v6 = vld [vmem:[%s366_s2 + $0x18] sm:$0xff]  ;;  %v153_v7 = vld [vmem:[%s366_s2 + $0x8] sm:$0xff]  ;;  %v243_v8 = vld [vmem:[#allocation3 + $0x20] sm:$0xff] }
   0x9   :  { %168 = vperm.xlu1 %263, %v154_v3   ;;  %158 = vperm.xlu0 %262, %v152_v4   ;;  %v242_v9 = vld [vmem:[#allocation3 + $0x18] sm:$0xff]  ;;  %v241_v10 = vld [vmem:[#allocation3 + $0x10] sm:$0xff]  ;;  %v43_v11 = vld [vmem:[%s364_s0] sm:$0xff]  ;;  %s320_s0 = smov [#allocation6]  }
   0xa   :  { %v44_v12 = vunpack.c.0.s8 %v43_v11  ;;  %v45_v13 = vunpack.c.1.s8 %v43_v11  ;;  %v46_v14 = vunpack.c.2.s8 %v43_v11  ;;  %v47_v15 = vunpack.c.3.s8 %v43_v11  ;;  %v240_v16 = vld [vmem:[#allocation3 + $0x8] sm:$0xff]  ;;  %v239_v21 = vld [vmem:[#allocation3] sm:$0xff]  ;;  %s192_s2 = sshll.u32 %s320_s0, 4  ;;  %s193_s2 = int_to_ptr.vmem [resolvable:$true] %s192_s2 }
   0xb   :  { %119 = vmatpush.bf16.msra.mxu0 %v245_v1  ;;  %248 = vmatpush.bf16.msra.mxu1 %v245_v1 }
   0xc   :  { %v48_v17 = vcvt.s32.f32 %v44_v12  ;;  %v49_v18 = vcvt.s32.f32 %v45_v13  ;;  %v50_v19 = vcvt.s32.f32 %v46_v14  ;;  %v51_v20 = vcvt.s32.f32 %v47_v15 }
   0xe   :  { %v52_v22 = vpack.c.bf16 %v49_v18, %v48_v17  ;;  %v53_v23 = vpack.c.bf16 %v51_v20, %v50_v19 }
   0xf   :  { %120 = vmatpush.bf16.msra.mxu0 %v244_v5  ;;  %249 = vmatpush.bf16.msra.mxu1 %v244_v5 }
  0x11   :  { %173 = vperm.xlu1 %263, %v155_v6   ;;  %163 = vperm.xlu0 %262, %v153_v7  }
  0x13   :  { %121 = vmatpush.bf16.msra.mxu0 %v243_v8  ;;  %250 = vmatpush.bf16.msra.mxu1 %v243_v8 }
  0x17   :  { %122 = vmatpush.bf16.msra.mxu0 %v242_v9  ;;  %251 = vmatpush.bf16.msra.mxu1 %v242_v9 }
  0x1b   :  { %123 = vmatpush.bf16.msra.mxu0 %v241_v10  ;;  %252 = vmatpush.bf16.msra.mxu1 %v241_v10 }
  0x1f   :  { %124 = vmatpush.bf16.msra.mxu0 %v240_v16  ;;  %253 = vmatpush.bf16.msra.mxu1 %v240_v16 }
  0x23   :  { %125 = vmatpush.bf16.msra.mxu0 %v239_v21  ;;  %254 = vmatpush.bf16.msra.mxu1 %v239_v21 }
  0x26   :  { %126 = vmatmul.bf16.vlgmr.msra.gmra.mxu0 %v52_v22  ;;  %131 = vmatmul.bf16.vlgmr.msra.gmra.mxu1 %v53_v23 }
  0x7b   :  { %v169_v24 = vpop.permute.xlu1 %168  ;;  %v159_v25 = vpop.permute.xlu0 %158 }
  0x83   :  { %v174_v32 = vpop.permute.xlu1 %173  ;;  %v164_v33 = vpop.permute.xlu0 %163 }
  0xa3   :  { %v127_v26 = vpop.f32.mrf.mxu0  ;;  %v132_v27 = vpop.f32.mrf.mxu1 }
  0xa4   :  { %v176_v28 = vmul.f32 %v159_v25, %v127_v26  ;;  %v178_v29 = vmul.f32 %v169_v24, %v132_v27 }
  0xa6   :  { %v180_v30 = vmax.f32 %v176_v28, 0.0  ;;  %v182_v31 = vmax.f32 %v178_v29, 0.0 }
  0xa8   :  { %184 = vst [vmem:[#allocation6] sm:$0xff] %v180_v30 }
  0xa9   :  { %186 = vst [vmem:[#allocation6 + $0x10] sm:$0xff] %v182_v31 }
  0xab   :  { %v129_v34 = vpop.f32.mrf.mxu0  ;;  %v134_v35 = vpop.f32.mrf.mxu1 }
  0xac   :  { %v177_v36 = vmul.f32 %v164_v33, %v129_v34  ;;  %v179_v37 = vmul.f32 %v174_v32, %v134_v35 }
  0xae   :  { %v181_v38 = vmax.f32 %v177_v36, 0.0  ;;  %v183_v39 = vmax.f32 %v179_v37, 0.0 }
  0xb0   :  { %185 = vst [vmem:[#allocation6 + $0x8] sm:$0xff] %v181_v38 }
  0xb1   :  { %187 = vst [vmem:[#allocation6 + $0x18] sm:$0xff] %v183_v39 }
  0xb2   :  { %200 = dma.vmem_to_hbm [thread:$0]  %s193_s2, 512, %s195_s30, [#allocation5], %s321_s4, %s321_s4, %s322_s5  }
  0xb3   :  { %314 = dma.done.wait [#allocation5], 512  }
  0xb4   :  { %315 = vsyncadd [#allocation5], 4294966784 }
  0xb5   :  { %205 = vsyncpa [#allocation4], 1 }
  0xb6   :  { %206 = vsyncpa [#allocation5], 1 }

</bundles_post_ra>
